<compile_context>
chip_gen: v7x
topology: tpu7x:2x2x1
jax: 0.10.0
libtpu: 0.0.40
codegen_flags: <defaults>
</compile_context>

<pallas_src>
import math

import jax
import jax.numpy as jnp
from jax import lax
from jax.experimental import pallas as pl
from jax.experimental.pallas import tpu as pltpu

CURVATURE = 1.0
EPS = 1e-7


def _round_up(x, m):
    return ((x + m - 1) // m) * m


def _cdiv(a, b):
    return (a + b - 1) // b


def _vmem_capacity_bytes():
    try:
        info = pltpu.get_tpu_info()
        cap = int(getattr(info, "vmem_capacity_bytes", 0) or 0)
        if cap > 0:
            return cap
    except Exception:
        pass
    return 128 * 1024 * 1024


def _device_kind():
    try:
        return jax.devices()[0].device_kind.lower()
    except Exception:
        return ""


def _tensorcores_per_chip():
    kind = _device_kind()
    return 2 if ("v7" in kind or "7x" in kind) else 1


def _default_batch_tile():
    kind = _device_kind()
    if "v5" in kind:
        return 384
    if "v6" in kind:
        return 768
    if "v7" in kind or "7x" in kind:
        return 512
    return 512


def _mobius_epilogue(mx, x_sq, m_bias, y2):
    """mx: (tb,Np) f32 = x@W; x_sq: (tb,1) f32 = ||x||^2; m_bias: (1,Np) f32;
    y2: scalar f32 = ||m_bias||^2.  Returns (tb,Np) f32."""
    c = jnp.float32(CURVATURE)
    sqrt_c = jnp.sqrt(c)
    inv_sqrt_c = lax.rsqrt(c)

    x_sq = jnp.maximum(x_sq, EPS * EPS)
    x_norm = jnp.sqrt(x_sq)
    inv_x_norm = lax.rsqrt(x_sq)                              # EUP

    mx_sq = jnp.sum(mx * mx, axis=-1, keepdims=True)          # (tb, 1)
    mx_norm = jnp.sqrt(mx_sq)
    mx_norm_safe = jnp.maximum(mx_norm, EPS)
    inv_mx_norm = pl.reciprocal(mx_norm_safe, approx=True)    # EUP

    # mobius_matvec scale; the ||xW||~0 select happens on the (tb,1) scale,
    # not on a (tb,Np) tensor.
    sc_xn = jnp.clip(sqrt_c * x_norm, 0.0, 1.0 - 1e-5)
    artanh_x = 0.5 * jnp.log((1.0 + sc_xn) / (1.0 - sc_xn))
    scale = jnp.tanh(mx_norm_safe * inv_x_norm * artanh_x) * (inv_mx_norm * inv_sqrt_c)
    scale = jnp.where(mx_norm <= EPS, 0.0, scale)             # (tb, 1)
    mv = scale * mx                                           # (tb, Np)

    # mobius_add(mv, m_bias); ||mv||^2 computed analytically from mv = scale * mx.
    x2 = (scale * scale) * mx_sq                              # (tb, 1)
    xy = jnp.sum(mv * m_bias, axis=-1, keepdims=True)         # (tb, 1)
    two_c_xy = 2.0 * c * xy
    num = (1.0 + two_c_xy + c * y2) * mv + (1.0 - c * x2) * m_bias
    den = 1.0 + two_c_xy + (c * c) * x2 * y2
    # Exact reciprocal here: `den` scales the final output directly.
    return num / jnp.maximum(den, EPS)


def _manifold_linear_kernel_resident(x_ref, w_ref, mb_ref, y2_ref, o_ref):
    x = x_ref[...]
    mx = jnp.dot(x, w_ref[...], preferred_element_type=jnp.float32)
    xf = x.astype(jnp.float32)
    x_sq = jnp.sum(xf * xf, axis=-1, keepdims=True)
    out = _mobius_epilogue(mx, x_sq, mb_ref[...], y2_ref[0])
    o_ref[...] = out.astype(o_ref.dtype)


def _manifold_linear_kernel_streamed(x_ref, w_ref, mb_ref, y2_ref, o_ref, acc_mx, acc_xsq):
    k = pl.program_id(1)

    @pl.when(k == 0)
    def _():
        acc_mx[...] = jnp.zeros_like(acc_mx)
        acc_xsq[...] = jnp.zeros_like(acc_xsq)

    x = x_ref[...]                                            # (tb, tk) native dtype -> MXU
    acc_mx[...] += jnp.dot(x, w_ref[...], preferred_element_type=jnp.float32)
    xf = x.astype(jnp.float32)
    acc_xsq[...] += jnp.sum(xf * xf, axis=-1, keepdims=True)

    @pl.when(k == pl.num_programs(1) - 1)
    def _():
        out = _mobius_epilogue(acc_mx[...], acc_xsq[...], mb_ref[...], y2_ref[0])
        o_ref[...] = out.astype(o_ref.dtype)


def manifold_linear(x, weight_t, bias, *, tb=None, tk=None):
    """Poincare-ball ManifoldLinear forward (curvature c=1).

    x: (B, in_dim); weight_t: (in_dim, out_dim) (= nn.Linear weight.t()); bias: (out_dim,).
    """
    B, in_dim = x.shape
    assert weight_t.shape[0] == in_dim
    out_dim = weight_t.shape[1]

    x_bytes = jnp.dtype(x.dtype).itemsize
    w_bytes = jnp.dtype(weight_t.dtype).itemsize
    out_bytes = x_bytes

    Np = _round_up(out_dim, 128)
    Kp_full = _round_up(in_dim, 128)

    # Sublane (second-to-last) dim only needs 8 (f32) / 16 (bf16); lane dims need 128.
    sub = 16 if x_bytes < 4 else 8

    vmem_cap = _vmem_capacity_bytes()
    budget = int(0.60 * vmem_cap)

    if tb is None:
        tb = _default_batch_tile()
    tb_eff = min(_round_up(int(tb), sub), _round_up(B, sub))

    # v7x megacore: keep >= 2 blocks on the "parallel" batch axis so both TCs get work.
    if _tensorcores_per_chip() >= 2:
        while _cdiv(B, tb_eff) < 2 and tb_eff >= 2 * sub:
            tb_eff = _round_up(tb_eff // 2, sub)

    def _streamed_tk(tb_rows):
        fixed = tb_rows * Np * 4 + tb_rows * 4                  # f32 accumulators
        fixed += 2 * tb_rows * Np * out_bytes                   # double-buffered output
        fixed += 2 * Np * 4                                     # m_bias
        per_tk = 2 * Np * w_bytes + 2 * tb_rows * x_bytes       # double-buffered W slab + x tile
        avail = budget - fixed
        if avail <= 0:
            return None
        t = (avail // per_tk) // 128 * 128
        if t < 128:
            return None
        return min(int(t), Kp_full)

    use_resident = False
    tk_eff = None
    while True:
        if tk is None:
            resident_bytes = (2 * Kp_full * Np * w_bytes            # weight (conservatively x2)
                              + 2 * tb_eff * Kp_full * x_bytes      # x double buffer
                              + 2 * tb_eff * Np * out_bytes         # output double buffer
                              + 2 * Np * 4)                         # m_bias
            if resident_bytes <= budget:
                use_resident = True
                Kp = Kp_full
                break
            t = _streamed_tk(tb_eff)
        else:
            t = min(_round_up(int(tk), 128), Kp_full)
        if t is not None:
            tk_eff = t
            Kp = _round_up(in_dim, tk_eff)
            break
        if tb_eff > sub:
            tb_eff = _round_up(tb_eff // 2, sub)
            continue
        tk_eff = 128                                            # last resort
        Kp = _round_up(in_dim, tk_eff)
        break

    Bp = _round_up(B, tb_eff)

    # TODO(synk): pre-pad weight_t and precompute exp_map0(bias) once at parameter setup
    # instead of on every forward call.
    if Bp != B or Kp != in_dim:
        x_p = jnp.pad(x, ((0, Bp - B), (0, Kp - in_dim)))
    else:
        x_p = x
    if Kp != in_dim or Np != out_dim:
        w_p = jnp.pad(weight_t, ((0, Kp - in_dim), (0, Np - out_dim)))
    else:
        w_p = weight_t

    # Hoisted, grid-invariant: m_bias = exp_map0(bias); y2 = ||m_bias||^2 as SMEM scalar.
    sqrt_c = math.sqrt(CURVATURE)
    b = bias.astype(jnp.float32).reshape(1, out_dim)
    b_norm = jnp.maximum(jnp.sqrt(jnp.sum(b * b, axis=-1, keepdims=True)), EPS)
    m_bias = jnp.tanh(sqrt_c * b_norm) * b / (sqrt_c * b_norm)
    y2 = jnp.sum(m_bias * m_bias, axis=-1).reshape(1)           # (1,) f32
    m_bias_p = jnp.pad(m_bias, ((0, 0), (0, Np - out_dim))) if Np != out_dim else m_bias

    nb = Bp // tb_eff
    smem_spec = pl.BlockSpec(memory_space=pltpu.MemorySpace.SMEM)

    if use_resident:
        grid = (nb,)
        in_specs = [
            pl.BlockSpec((tb_eff, Kp), lambda i: (i, 0)),           # x tile
            pl.BlockSpec((Kp, Np), lambda i: (0, 0)),               # resident weight (one fetch)
            pl.BlockSpec((1, Np), lambda i: (0, 0)),                # m_bias
            smem_spec,                                              # y2 scalar
        ]
        out_specs = pl.BlockSpec((tb_eff, Np), lambda i: (i, 0))
        scratch_shapes = []
        kernel = _manifold_linear_kernel_resident
        dim_sem = ("parallel",)
        w_stream_bytes = Kp * Np * w_bytes
    else:
        grid = (nb, Kp // tk_eff)
        in_specs = [
            pl.BlockSpec((tb_eff, tk_eff), lambda i, k: (i, k)),    # x tile
            pl.BlockSpec((tk_eff, Np), lambda i, k: (k, 0)),        # weight K-slab
            pl.BlockSpec((1, Np), lambda i, k: (0, 0)),             # m_bias
            smem_spec,                                              # y2 scalar
        ]
        out_specs = pl.BlockSpec((tb_eff, Np), lambda i, k: (i, 0))
        scratch_shapes = [
            pltpu.VMEM((tb_eff, Np), jnp.float32),                  # xW accumulator
            pltpu.VMEM((tb_eff, 1), jnp.float32),                   # ||x||^2 accumulator
        ]
        kernel = _manifold_linear_kernel_streamed
        dim_sem = ("parallel", "arbitrary")
        w_stream_bytes = nb * Kp * Np * w_bytes                     # re-streamed per batch tile

    cost = pl.CostEstimate(
        flops=2 * Bp * Kp * Np,
        transcendentals=7 * Bp,
        bytes_accessed=(Bp * Kp * x_bytes + w_stream_bytes + Bp * Np * out_bytes
                        + Np * 4 + 4),
    )

    out_p = pl.pallas_call(
        kernel,
        out_shape=jax.ShapeDtypeStruct((Bp, Np), x.dtype),
        grid_spec=pltpu.PrefetchScalarGridSpec(
            num_scalar_prefetch=0,
            grid=grid,
            in_specs=in_specs,
            out_specs=out_specs,
            scratch_shapes=scratch_shapes,
        ),
        compiler_params=pltpu.CompilerParams(
            dimension_semantics=dim_sem,
            vmem_limit_bytes=int(0.70 * vmem_cap),
        ),
        cost_estimate=cost,
    )(x_p, w_p, m_bias_p, y2)

    return out_p[:B, :out_dim]


def _reference(x, weight_t, bias):
    c = CURVATURE
    sqrt_c = jnp.sqrt(jnp.float32(c))
    x = x.astype(jnp.float32)
    mx = x @ weight_t.astype(jnp.float32)
    x_norm = jnp.maximum(jnp.linalg.norm(x, axis=-1, keepdims=True), EPS)
    mx_norm = jnp.linalg.norm(mx, axis=-1, keepdims=True)
    mx_norm_safe = jnp.maximum(mx_norm, EPS)
    sc_xn = jnp.clip(sqrt_c * x_norm, 0.0, 1.0 - 1e-5)
    artanh_x = 0.5 * jnp.log((1.0 + sc_xn) / (1.0 - sc_xn))
    mv = jnp.tanh(mx_norm_safe / x_norm * artanh_x) * mx / (mx_norm_safe * sqrt_c)
    mv = jnp.where(mx_norm <= EPS, jnp.zeros_like(mv), mv)
    b = bias.astype(jnp.float32)[None, :]
    b_norm = jnp.maximum(jnp.linalg.norm(b, axis=-1, keepdims=True), EPS)
    m_bias = jnp.tanh(sqrt_c * b_norm) * b / (sqrt_c * b_norm)
    x2 = jnp.sum(mv * mv, axis=-1, keepdims=True)
    y2 = jnp.sum(m_bias * m_bias, axis=-1, keepdims=True)
    xy = jnp.sum(mv * m_bias, axis=-1, keepdims=True)
    num = (1.0 + 2.0 * c * xy + c * y2) * mv + (1.0 - c * x2) * m_bias
    den = 1.0 + 2.0 * c * xy + c * c * x2 * y2
    return num / jnp.maximum(den, EPS)


if __name__ == "__main__":
    key = jax.random.PRNGKey(0)
    kx, kw, kb, kx2, kw2, kb2 = jax.random.split(key, 6)

    # --- Small layer: resident-weight fast path (f32 + bf16) ---
    B, in_dim, out_dim = 8, 32, 32
    x = (0.1 * jax.random.normal(kx, (B, in_dim))).astype(jnp.float32)   # inside unit ball
    bound = 1.0 / math.sqrt(in_dim)
    weight_t = jax.random.uniform(kw, (in_dim, out_dim), jnp.float32, -bound, bound)
    bias = jax.random.uniform(kb, (out_dim,), jnp.float32, -bound, bound)

    ref = _reference(x, weight_t, bias)
    out = jax.block_until_ready(manifold_linear(x, weight_t, bias))
    assert out.shape == (B, out_dim)
    assert jnp.allclose(out, ref, atol=5e-3, rtol=5e-3), "f32 kernel mismatch vs reference"

    out_bf16 = jax.block_until_ready(
        manifold_linear(x.astype(jnp.bfloat16), weight_t.astype(jnp.bfloat16), bias)
    )
    assert out_bf16.shape == (B, out_dim)
    assert jnp.allclose(out_bf16.astype(jnp.float32), ref, atol=3e-2, rtol=3e-2), \
        "bf16 kernel mismatch vs reference"

    # --- K-streamed accumulator path (forced with an explicit small tk) ---
    B2, in_dim2, out_dim2 = 16, 256, 128
    x2 = (0.04 * jax.random.normal(kx2, (B2, in_dim2))).astype(jnp.float32)
    bound2 = 1.0 / math.sqrt(in_dim2)
    weight_t2 = jax.random.uniform(kw2, (in_dim2, out_dim2), jnp.float32, -bound2, bound2)
    bias2 = jax.random.uniform(kb2, (out_dim2,), jnp.float32, -bound2, bound2)

    ref2 = _reference(x2, weight_t2, bias2)
    out2 = jax.block_until_ready(manifold_linear(x2, weight_t2, bias2, tk=128))
    assert out2.shape == (B2, out_dim2)
    assert jnp.allclose(out2, ref2, atol=5e-3, rtol=5e-3), "streamed kernel mismatch vs reference"

    print("KERNEL_OK")
</pallas_src>

<mosaic_0001>
module attributes {stable_mosaic.version = 11 : i64} {
  func.func @_manifold_linear_kernel_resident(%arg0: i32, %arg1: memref<8x128xf32, #tpu.memory_space<vmem>>, %arg2: memref<128x128xf32, #tpu.memory_space<vmem>>, %arg3: memref<1x128xf32, #tpu.memory_space<vmem>>, %arg4: memref<1xf32, #tpu.memory_space<smem>>, %arg5: memref<8x128xf32, #tpu.memory_space<vmem>>) attributes {dimension_semantics = [#tpu.dimension_semantics<parallel>], iteration_bounds = array<i64: 1>, scalar_prefetch = 0 : i64, scratch_operands = 0 : i64, tpu.core_type = #tpu.core_type<tc>, window_params = [{transform_indices = @transform_0, window_bounds = array<i64: 8, 128>}, {pipeline_mode = #tpu.pipeline_mode<synchronous>, transform_indices = @transform_1, window_bounds = array<i64: 128, 128>}, {pipeline_mode = #tpu.pipeline_mode<synchronous>, transform_indices = @transform_2, window_bounds = array<i64: 1, 128>}, {transform_indices = @transform_3, window_bounds = array<i64: 1>}, {transform_indices = @transform_4, window_bounds = array<i64: 8, 128>}]} {
    %c0 = arith.constant 0 : index
    %c0_0 = arith.constant 0 : index
    %0 = vector.load %arg1[%c0, %c0_0] : memref<8x128xf32, #tpu.memory_space<vmem>>, vector<8x128xf32>
    %c0_1 = arith.constant 0 : index
    %c0_2 = arith.constant 0 : index
    %1 = vector.load %arg2[%c0_1, %c0_2] : memref<128x128xf32, #tpu.memory_space<vmem>>, vector<128x128xf32>
    %cst = arith.constant dense<0.000000e+00> : vector<8x128xf32>
    %2 = tpu.matmul %0, %1, %cst {dimension_numbers = #tpu.dot_dimension_numbers<[1], [0], [0], [1], [0, 0, 1, 1], [], []>} : vector<8x128xf32>, vector<128x128xf32>, vector<8x128xf32> -> vector<8x128xf32>
    %3 = arith.mulf %0, %0 : vector<8x128xf32>
    %cst_3 = arith.constant dense<0.000000e+00> : vector<8xf32>
    %4 = vector.multi_reduction <add>, %3, %cst_3 [1] : vector<8x128xf32> to vector<8xf32>
    %5 = vector.shape_cast %4 : vector<8xf32> to vector<8x1xf32>
    %c0_4 = arith.constant 0 : index
    %c0_5 = arith.constant 0 : index
    %6 = vector.load %arg3[%c0_4, %c0_5] : memref<1x128xf32, #tpu.memory_space<vmem>>, vector<1x128xf32>
    %c0_6 = arith.constant 0 : index
    %7 = memref.load %arg4[%c0_6] : memref<1xf32, #tpu.memory_space<smem>>
    %cst_7 = arith.constant 1.000000e+00 : f32
    %8 = math.sqrt %cst_7 : f32
    %cst_8 = arith.constant 1.000000e+00 : f32
    %9 = math.rsqrt %cst_8 : f32
    %cst_9 = arith.constant 9.99999982E-15 : f32
    %10 = vector.broadcast %cst_9 : f32 to vector<8x1xf32>
    %11 = arith.maximumf %5, %10 : vector<8x1xf32>
    %12 = math.sqrt %11 : vector<8x1xf32>
    %13 = math.rsqrt %11 : vector<8x1xf32>
    %14 = arith.mulf %2, %2 : vector<8x128xf32>
    %cst_10 = arith.constant dense<0.000000e+00> : vector<8xf32>
    %15 = vector.multi_reduction <add>, %14, %cst_10 [1] : vector<8x128xf32> to vector<8xf32>
    %16 = vector.shape_cast %15 : vector<8xf32> to vector<8x1xf32>
    %17 = math.sqrt %16 : vector<8x1xf32>
    %cst_11 = arith.constant 1.000000e-07 : f32
    %18 = vector.broadcast %cst_11 : f32 to vector<8x1xf32>
    %19 = arith.maximumf %17, %18 : vector<8x1xf32>
    %20 = tpu.reciprocal %19 {approx = true} : vector<8x1xf32> -> vector<8x1xf32>
    %21 = vector.broadcast %8 : f32 to vector<8x1xf32>
    %22 = arith.mulf %21, %12 : vector<8x1xf32>
    %cst_12 = arith.constant 0.000000e+00 : f32
    %cst_13 = arith.constant 0.999989986 : f32
    %23 = vector.broadcast %cst_12 : f32 to vector<8x1xf32>
    %24 = arith.maximumf %23, %22 : vector<8x1xf32>
    %25 = vector.broadcast %cst_13 : f32 to vector<8x1xf32>
    %26 = arith.minimumf %25, %24 : vector<8x1xf32>
    %cst_14 = arith.constant 1.000000e+00 : f32
    %27 = vector.broadcast %cst_14 : f32 to vector<8x1xf32>
    %28 = arith.addf %27, %26 : vector<8x1xf32>
    %cst_15 = arith.constant 1.000000e+00 : f32
    %29 = vector.broadcast %cst_15 : f32 to vector<8x1xf32>
    %30 = arith.subf %29, %26 : vector<8x1xf32>
    %31 = arith.divf %28, %30 : vector<8x1xf32>
    %32 = math.log %31 : vector<8x1xf32>
    %cst_16 = arith.constant 5.000000e-01 : f32
    %33 = vector.broadcast %cst_16 : f32 to vector<8x1xf32>
    %34 = arith.mulf %33, %32 : vector<8x1xf32>
    %35 = arith.mulf %19, %13 : vector<8x1xf32>
    %36 = arith.mulf %35, %34 : vector<8x1xf32>
    %37 = math.tanh %36 : vector<8x1xf32>
    %38 = vector.broadcast %9 : f32 to vector<8x1xf32>
    %39 = arith.mulf %20, %38 : vector<8x1xf32>
    %40 = arith.mulf %37, %39 : vector<8x1xf32>
    %cst_17 = arith.constant 1.000000e-07 : f32
    %41 = vector.broadcast %cst_17 : f32 to vector<8x1xf32>
    %42 = arith.cmpf ole, %17, %41 : vector<8x1xf32>
    %cst_18 = arith.constant 0.000000e+00 : f32
    %43 = vector.broadcast %cst_18 : f32 to vector<8x1xf32>
    %44 = arith.select %42, %43, %40 : vector<8x1xi1>, vector<8x1xf32>
    %45 = vector.broadcast %44 : vector<8x1xf32> to vector<8x128xf32>
    %46 = arith.mulf %45, %2 : vector<8x128xf32>
    %47 = arith.mulf %44, %44 : vector<8x1xf32>
    %48 = arith.mulf %47, %16 : vector<8x1xf32>
    %49 = vector.broadcast %6 : vector<1x128xf32> to vector<8x128xf32>
    %50 = arith.mulf %46, %49 : vector<8x128xf32>
    %cst_19 = arith.constant dense<0.000000e+00> : vector<8xf32>
    %51 = vector.multi_reduction <add>, %50, %cst_19 [1] : vector<8x128xf32> to vector<8xf32>
    %52 = vector.shape_cast %51 : vector<8xf32> to vector<8x1xf32>
    %cst_20 = arith.constant 2.000000e+00 : f32
    %cst_21 = arith.constant 1.000000e+00 : f32
    %53 = arith.mulf %cst_20, %cst_21 : f32
    %54 = vector.broadcast %53 : f32 to vector<8x1xf32>
    %55 = arith.mulf %54, %52 : vector<8x1xf32>
    %cst_22 = arith.constant 1.000000e+00 : f32
    %56 = vector.broadcast %cst_22 : f32 to vector<8x1xf32>
    %57 = arith.addf %56, %55 : vector<8x1xf32>
    %cst_23 = arith.constant 1.000000e+00 : f32
    %58 = arith.mulf %cst_23, %7 : f32
    %59 = vector.broadcast %58 : f32 to vector<8x1xf32>
    %60 = arith.addf %57, %59 : vector<8x1xf32>
    %61 = vector.broadcast %60 : vector<8x1xf32> to vector<8x128xf32>
    %62 = arith.mulf %61, %46 : vector<8x128xf32>
    %cst_24 = arith.constant 1.000000e+00 : f32
    %63 = vector.broadcast %cst_24 : f32 to vector<8x1xf32>
    %64 = arith.mulf %63, %48 : vector<8x1xf32>
    %cst_25 = arith.constant 1.000000e+00 : f32
    %65 = vector.broadcast %cst_25 : f32 to vector<8x1xf32>
    %66 = arith.subf %65, %64 : vector<8x1xf32>
    %67 = vector.broadcast %66 : vector<8x1xf32> to vector<8x128xf32>
    %68 = vector.broadcast %6 : vector<1x128xf32> to vector<8x128xf32>
    %69 = arith.mulf %67, %68 : vector<8x128xf32>
    %70 = arith.addf %62, %69 : vector<8x128xf32>
    %cst_26 = arith.constant 1.000000e+00 : f32
    %71 = vector.broadcast %cst_26 : f32 to vector<8x1xf32>
    %72 = arith.addf %71, %55 : vector<8x1xf32>
    %cst_27 = arith.constant 1.000000e+00 : f32
    %cst_28 = arith.constant 1.000000e+00 : f32
    %73 = arith.mulf %cst_27, %cst_28 : f32
    %74 = vector.broadcast %73 : f32 to vector<8x1xf32>
    %75 = arith.mulf %74, %48 : vector<8x1xf32>
    %76 = vector.broadcast %7 : f32 to vector<8x1xf32>
    %77 = arith.mulf %75, %76 : vector<8x1xf32>
    %78 = arith.addf %72, %77 : vector<8x1xf32>
    %cst_29 = arith.constant 1.000000e-07 : f32
    %79 = vector.broadcast %cst_29 : f32 to vector<8x1xf32>
    %80 = arith.maximumf %78, %79 : vector<8x1xf32>
    %81 = vector.broadcast %80 : vector<8x1xf32> to vector<8x128xf32>
    %82 = arith.divf %70, %81 : vector<8x128xf32>
    %c0_30 = arith.constant 0 : index
    %c0_31 = arith.constant 0 : index
    %83 = vector.load %arg5[%c0_30, %c0_31] : memref<8x128xf32, #tpu.memory_space<vmem>>, vector<8x128xf32>
    tpu.vector_store %arg5[%c0_30, %c0_31], %82 {strides = array<i32>} : memref<8x128xf32, #tpu.memory_space<vmem>>, vector<8x128xf32>,
    return
  }
  func.func @transform_0(%arg0: i32) -> (i32, i32) {
    %c0_i32 = arith.constant 0 : i32
    %c0_i32_0 = arith.constant 0 : i32
    return %arg0, %c0_i32 : i32, i32
  }
  func.func @transform_1(%arg0: i32) -> (i32, i32) {
    %c0_i32 = arith.constant 0 : i32
    %c0_i32_0 = arith.constant 0 : i32
    %c0_i32_1 = arith.constant 0 : i32
    return %c0_i32, %c0_i32_0 : i32, i32
  }
  func.func @transform_2(%arg0: i32) -> (i32, i32) {
    %c0_i32 = arith.constant 0 : i32
    %c0_i32_0 = arith.constant 0 : i32
    %c0_i32_1 = arith.constant 0 : i32
    return %c0_i32, %c0_i32_0 : i32, i32
  }
  func.func @transform_3(%arg0: i32) -> i32 {
    %c0_i32 = arith.constant 0 : i32
    %c0_i32_0 = arith.constant 0 : i32
    return %c0_i32 : i32
  }
  func.func @transform_4(%arg0: i32) -> (i32, i32) {
    %c0_i32 = arith.constant 0 : i32
    %c0_i32_0 = arith.constant 0 : i32
    return %arg0, %c0_i32 : i32, i32
  }
}

</mosaic_0001>

<bundles_post_ra>
// kernel: tpu_custom_call.1
= control target key start
LH: loop header
LB: loop body
LE: loop exit
PB: predicated region body
PF: predicated region fallthrough
CT: control target
= control target key end

     0   :  { %10 = vsyncpa [#allocation4], 0  ;;  %s505_s0 = inlined_call_operand.hbm [shape: f32[8,128], index: 0, kind: input, shape index: {}]   ;;  %s506_s1 = inlined_call_operand.hbm [shape: f32[128,128], index: 1, kind: input, shape index: {}]   ;;  %s507_s2 = inlined_call_operand.hbm [shape: f32[1,128], index: 2, kind: input, shape index: {}]   ;;  %s508_s3 = inlined_call_operand.<no memory space> [shape: f32[1], index: 3, kind: input, shape index: {}]   ;;  %s509_s4 = inlined_call_operand.hbm [shape: f32[8,128], index: 4, kind: output, shape index: {}]  }
   0x1   :  { %11 = vsyncpa [#allocation7], 0 }
   0x2   :  { %12 = vsyncpa [#allocation5], 0  ;;  %s420_s15 = smov [#allocation6]   ;;  %s326_s19 = scalar_lea.hbm %s506_s1, 2048 }
   0x3   :  { %s28_s16 = sshll.u32 %s420_s15, 4  ;;  %p327_p0 = scmp.ne.s32.totalorder %s506_s1, %s326_s19  ;;  %s29_s16 = int_to_ptr.vmem [resolvable:$true] %s28_s16 }
   0x4   :  { %p330_p1 = scmp.lt.u32.totalorder %s326_s19, %s506_s1 }
   0x6   :  { %p332_p2 = pnand %p330_p1, %p327_p0 }
   0x8   :  { %335 = shalt.err (!%p332_p2)
}
   0x9   :  { %s336_s24 = scalar_lea.vmem %s29_s16, 2048  ;;  %p341_p4 = scmp.lt.s32.totalorder %s29_s16, %s29_s16 }
   0xa   :  { %p337_p3 = scmp.ne.s32.totalorder %s29_s16, %s336_s24  ;;  %p342_p5 = scmp.lt.s32.totalorder %s336_s24, %s336_s24 }
   0xc   :  { %p343_p6 = por %p342_p5, %p341_p4 }
   0xe   :  { %p344_p7 = pnand %p343_p6, %p337_p3 }
  0x10   :  { %347 = shalt.err (!%p344_p7)
}
  0x11   :  { %s421_s25 = smov 128   ;;  %s422_s26 = smov 8  }
  0x12   :  { %34 = dma.hbm_to_vmem [thread:$0]  %s506_s1, 2048, %s29_s16, [#allocation7], %s421_s25, %s421_s25, %s422_s26  }
  0x13   :  { %s423_s29 = smov [#allocation3]   ;;  %s424_s5 = smov [#allocation8]  }
  0x14   :  { %s19_s30 = sshll.u32 %s423_s29, 4  ;;  %s41_s6 = sshll.u32 %s424_s5, 4  ;;  %s20_s30 = int_to_ptr.vmem [resolvable:$true] %s19_s30  ;;  %s42_s6 = int_to_ptr.vmem [resolvable:$true] %s41_s6 }
  0x15   :  { %s348_s9 = scalar_lea.hbm %s505_s0, 128 }
  0x16   :  { %p349_p8 = scmp.ne.s32.totalorder %s505_s0, %s348_s9  ;;  %p352_p9 = scmp.lt.u32.totalorder %s348_s9, %s505_s0 }
  0x18   :  { %p354_p10 = pnand %p352_p9, %p349_p8 }
  0x1a   :  { %357 = shalt.err (!%p354_p10)
}
  0x1b   :  { %s358_s1 = scalar_lea.vmem %s20_s30, 128  ;;  %p363_p12 = scmp.lt.s32.totalorder %s20_s30, %s20_s30 }
  0x1c   :  { %p359_p11 = scmp.ne.s32.totalorder %s20_s30, %s358_s1  ;;  %p364_p13 = scmp.lt.s32.totalorder %s358_s1, %s358_s1 }
  0x1e   :  { %p365_p0 = por %p364_p13, %p363_p12 }
  0x20   :  { %p366_p1 = pnand %p365_p0, %p359_p11 }
  0x22   :  { %369 = shalt.err (!%p366_p1)
}
  0x23   :  { %22 = dma.hbm_to_vmem [thread:$0]  %s505_s0, 128, %s20_s30, [#allocation4]  }
  0x24   :  { %s370_s18 = scalar_lea.hbm %s507_s2, 16 }
  0x25   :  { %p371_p2 = scmp.ne.s32.totalorder %s507_s2, %s370_s18  ;;  %p374_p3 = scmp.lt.u32.totalorder %s370_s18, %s507_s2 }
  0x27   :  { %p376_p4 = pnand %p374_p3, %p371_p2 }
  0x29   :  { %379 = shalt.err (!%p376_p4)
}
  0x2a   :  { %s380_s23 = scalar_lea.vmem %s42_s6, 16  ;;  %s384_s24 = scalar_lea.vmem %s42_s6, 32 }
  0x2b   :  { %p381_p5 = scmp.ne.s32.totalorder %s42_s6, %s380_s23  ;;  %p385_p6 = scmp.lt.s32.totalorder %s42_s6, %s42_s6 }
  0x2c   :  { %p386_p7 = scmp.lt.s32.totalorder %s384_s24, %s380_s23 }
  0x2e   :  { %p387_p8 = por %p386_p7, %p385_p6 }
  0x30   :  { %p388_p9 = pnand %p387_p8, %p381_p5 }
  0x32   :  { %391 = shalt.err (!%p388_p9)
}
  0x33   :  { %44 = dma.hbm_to_vmem [thread:$0]  %s507_s2, 16, %s42_s6, [#allocation7]  }
  0x34   :  { %414 = dma.done.wait [#allocation4], 128  }
  0x35   :  { %415 = vsyncadd [#allocation4], 4294967168 }
  0x36   :  { %416 = dma.done.wait [#allocation7], 2064  }
  0x37   :  { %417 = vsyncadd [#allocation7], 4294965232  ;;  %v425_v0 = vmov 0.0|0.0   ;;  %vm426_vm0 = vmmov 0   ;;  %v427_v1 = vmov 0.0   ;;  %v57_v2 = vld [vmem:[#allocation6] sm:$0xff] }
  0x38   :  { %279 = vmatprep.subr.bf16.mxu0 %v425_v0  ;;  %276 = vmatprep.mubr.msk.f32.mxu0 %vm426_vm0, %v427_v1  ;;  %v58_v3 = vld [vmem:[#allocation6 + $0x8] sm:$0xff]  ;;  %v59_v4 = vld [vmem:[#allocation6 + $0x10] sm:$0xff]  ;;  %v60_v6 = vld [vmem:[#allocation6 + $0x18] sm:$0xff]  ;;  %s428_s27 = smov [#allocation9]  }
  0x39   :  { %v280_v5 = vpack.c.bf16 %v58_v3, %v57_v2  ;;  %v283_v7 = vpack.c.bf16 %v60_v6, %v59_v4  ;;  %v61_v8 = vld [vmem:[#allocation6 + $0x20] sm:$0xff]  ;;  %v62_v9 = vld [vmem:[#allocation6 + $0x28] sm:$0xff]  ;;  %v56_v10 = vld [vmem:[#allocation3] sm:$0xff]  ;;  %v198_v3 = vstv %s508_s3  ;;  %s216_s28 = sshll.u32 %s428_s27, 4  ;;  %s217_s28 = int_to_ptr.vmem [resolvable:$true] %s216_s28 }
  0x3a   :  { %v143_v11 = vmul.f32 %v56_v10, %v56_v10  ;;  %v286_v12 = vpack.c.bf16 %v62_v9, %v61_v8  ;;  %v63_v13 = vld [vmem:[#allocation6 + $0x30] sm:$0xff]  ;;  %v64_v14 = vld [vmem:[#allocation6 + $0x38] sm:$0xff]  ;;  %v65_v16 = vld [vmem:[#allocation6 + $0x40] sm:$0xff]  ;;  %s392_s29 = scalar_lea.vmem %s217_s28, 128  ;;  %p397_p11 = scmp.lt.s32.totalorder %s217_s28, %s217_s28 }
  0x3b   :  { %281 = vmatpush3.bf16.msra.mxu0 %v280_v5  ;;  %v289_v15 = vpack.c.bf16 %v64_v14, %v63_v13  ;;  %v66_v17 = vld [vmem:[#allocation6 + $0x48] sm:$0xff]  ;;  %v67_v19 = vld [vmem:[#allocation6 + $0x50] sm:$0xff]  ;;  %v68_v20 = vld [vmem:[#allocation6 + $0x58] sm:$0xff]  ;;  %p393_p10 = scmp.ne.s32.totalorder %s217_s28, %s392_s29  ;;  %p398_p12 = scmp.lt.s32.totalorder %s392_s29, %s392_s29 }
  0x3c   :  { %282 = vmatprep.subr.bf16.mxu0 %v425_v0  ;;  %144 = vadd.xlane.f32.xlu0 %v143_v11  ;;  %v292_v18 = vpack.c.bf16 %v66_v17, %v65_v16  ;;  %v295_v21 = vpack.c.bf16 %v68_v20, %v67_v19  ;;  %v69_v22 = vld [vmem:[#allocation6 + $0x60] sm:$0xff]  ;;  %v70_v23 = vld [vmem:[#allocation6 + $0x68] sm:$0xff]  ;;  %v71_v25 = vld [vmem:[#allocation6 + $0x70] sm:$0xff] }
  0x3d   :  { %v298_v24 = vpack.c.bf16 %v70_v23, %v69_v22  ;;  %v72_v26 = vld [vmem:[#allocation6 + $0x78] sm:$0xff]  ;;  %v226_v59 = vld [vmem:[#allocation8] ss:$0 sm:$0xff]  ;;  %p399_p13 = por %p398_p12, %p397_p11 }
  0x3e   :  { %v301_v27 = vpack.c.bf16 %v72_v26, %v71_v25 }
  0x3f   :  { %284 = vmatpush3.bf16.msra.mxu0 %v283_v7  ;;  %p400_p0 = pnand %p399_p13, %p393_p10 }
  0x40   :  { %285 = vmatprep.subr.bf16.mxu0 %v425_v0 }
  0x43   :  { %287 = vmatpush3.bf16.msra.mxu0 %v286_v12 }
  0x44   :  { %288 = vmatprep.subr.bf16.mxu0 %v425_v0 }
  0x47   :  { %290 = vmatpush3.bf16.msra.mxu0 %v289_v15 }
  0x48   :  { %291 = vmatprep.subr.bf16.mxu0 %v425_v0 }
  0x4b   :  { %293 = vmatpush3.bf16.msra.mxu0 %v292_v18 }
  0x4c   :  { %294 = vmatprep.subr.bf16.mxu0 %v425_v0 }
  0x4f   :  { %296 = vmatpush3.bf16.msra.mxu0 %v295_v21 }
  0x50   :  { %297 = vmatprep.subr.bf16.mxu0 %v425_v0 }
  0x53   :  { %299 = vmatpush3.bf16.msra.mxu0 %v298_v24 }
  0x54   :  { %300 = vmatprep.subr.bf16.mxu0 %v425_v0 }
  0x57   :  { %302 = vmatpush3.bf16.msra.mxu0 %v301_v27 }
  0x5a   :  { %277 = vmatmul.mubr.f32.vlgmr.msra.gmra.mrb[0].mxu0 %v56_v10 }
  0xc9   :  { %v145_v31 = vpop.xlane.xlu0 %144 }
  0xca   :  { %v148_v32 = vmax.f32 %v145_v31, 1e-14 }
  0xcc   :  { %312 = vrsqrt.f32 %v148_v32  ;;  %vm151_vm1 = vcmp.eq.f32.partialorder %v148_v32, inf  ;;  %v154_v35 = vand.u32 2147483648, %v148_v32  ;;  %vm153_vm2 = vcmp.eq.f32.partialorder %v148_v32, 0.0 }
  0xd6   :  { %v313_v33 = vpop.eup %312 }
  0xd7   :  { %v150_v34 = vmul.f32 %v313_v33, %v148_v32 }
  0xd9   :  { %v152_v36 = vsel %vm151_vm1, %v148_v32, %v150_v34 }
  0xda   :  { %v155_v37 = vsel %vm153_vm2, %v154_v35, %v152_v36 }
  0xdb   :  { %v169_v38 = vmax.f32 %v155_v37, 0.0 }
  0xdd   :  { %v170_v39 = vmin.f32 %v169_v38, 0.99999 }
  0xdf   :  { %v172_v40 = vsub.f32 1.0, %v170_v39  ;;  %v171_v41 = vadd.f32 1.0, %v170_v39 }
  0xe1   :  { %314 = vrcp.f32 %v172_v40 }
  0xeb   :  { %v315_v42 = vpop.eup %314 }
  0xec   :  { %v174_v43 = vmul.f32 %v315_v42, %v171_v41 }
  0xee   :  { %316 = vlog2.f32 %v174_v43 }
  0xf8   :  { %v317_v45 = vpop.eup %316 }
  0xf9   :  { %v176_v50 = vmul.f32 0.6931472, %v317_v45 }
  0xfb   :  { %v177_v53 = vmul.f32 0.5, %v176_v50 }
 0x12d   :  { %v139_v28 = vpop.f32.mrb[0].mxu0 }
 0x12e   :  { %v278_v29 = vpop.f32.mrb[1].mxu0  ;;  %v157_v30 = vmul.f32 %v139_v28, %v139_v28 }
 0x130   :  { %158 = vadd.xlane.f32.xlu0 %v157_v30 }
 0x1bd   :  { %v159_v44 = vpop.xlane.xlu0 %158 }
 0x1be   :  { %318 = vrsqrt.f32 %v159_v44  ;;  %vm162_vm3 = vcmp.eq.f32.partialorder %v159_v44, inf  ;;  %v165_v48 = vand.u32 2147483648, %v159_v44  ;;  %vm164_vm4 = vcmp.eq.f32.partialorder %v159_v44, 0.0 }
 0x1c8   :  { %v319_v46 = vpop.eup %318 }
 0x1c9   :  { %v161_v47 = vmul.f32 %v319_v46, %v159_v44 }
 0x1cb   :  { %v163_v49 = vsel %vm162_vm3, %v159_v44, %v161_v47 }
 0x1cc   :  { %v166_v51 = vsel %vm164_vm4, %v165_v48, %v163_v49 }
 0x1cd   :  { %v167_v52 = vmax.f32 %v166_v51, 1e-07  ;;  %vm182_vm5 = vcmp.le.f32.partialorder %v166_v51, 1e-07 }
 0x1cf   :  { %v178_v54 = vmul.f32 %v313_v33, %v167_v52  ;;  %320 = vrcp.f32 %v167_v52 }
 0x1d1   :  { %v179_v55 = vmul.f32 %v178_v54, %v177_v53 }
 0x1d3   :  { %322 = vtanh.f32 %v179_v55 }
 0x1d9   :  { %v321_v56 = vpop.eup %320 }
 0x1dd   :  { %v323_v57 = vpop.eup %322 }
 0x1de   :  { %v181_v58 = vmul.f32 %v323_v57, %v321_v56 }
 0x1e0   :  { %v183_v60 = vsel %vm182_vm5, 0.0, %v181_v58 }
 0x1e1   :  { %v184_v61 = vmul.f32 %v183_v60, %v139_v28  ;;  %v185_v62 = vmul.f32 %v183_v60, %v183_v60 }
 0x1e3   :  { %v186_v63 = vmul.f32 %v185_v62, %v159_v44  ;;  %v193_v0 = vmul.f32 %v226_v59, %v184_v61 }
 0x1e5   :  { %v201_v1 = vsub.f32 1.0, %v186_v63  ;;  %194 = vadd.xlane.f32.xlu1 %v193_v0  ;;  %v204_v6 = vmul.f32 %v198_v3, %v186_v63 }
 0x1e7   :  { %v202_v2 = vmul.f32 %v226_v59, %v201_v1 }
 0x272   :  { %v195_v4 = vpop.xlane.xlu1 %194 }
 0x273   :  { %v196_v5 = vmul.f32 2.0, %v195_v4 }
 0x275   :  { %v197_v7 = vadd.f32 1.0, %v196_v5 }
 0x277   :  { %v205_v8 = vadd.f32 %v204_v6, %v197_v7  ;;  %v199_v10 = vadd.f32 %v198_v3, %v197_v7 }
 0x279   :  { %v206_v9 = vmax.f32 %v205_v8, 1e-07  ;;  %v200_v11 = vmul.f32 %v199_v10, %v184_v61 }
 0x27b   :  { %324 = vrcp.f32 %v206_v9  ;;  %v203_v12 = vadd.f32 %v202_v2, %v200_v11 }
 0x285   :  { %v325_v13 = vpop.eup %324 }
 0x286   :  { %v208_v14 = vmul.f32 %v325_v13, %v203_v12 }
 0x288   :  { %209 = vst [vmem:[#allocation9] sm:$0xff] %v208_v14 }
 0x289   :  { %403 = shalt.err (!%p400_p0)
}
 0x28a   :  { %s404_s5 = scalar_lea.hbm %s509_s4, 128 }
 0x28b   :  { %p405_p1 = scmp.ne.s32.totalorder %s509_s4, %s404_s5  ;;  %p408_p2 = scmp.lt.u32.totalorder %s404_s5, %s509_s4 }
 0x28d   :  { %p410_p3 = pnand %p408_p2, %p405_p1 }
 0x28f   :  { %413 = shalt.err (!%p410_p3)
}
 0x290   :  { %219 = dma.vmem_to_hbm [thread:$0]  %s217_s28, 128, %s509_s4, [#allocation5]  }
 0x291   :  { %418 = dma.done.wait [#allocation5], 128  }
 0x292   :  { %419 = vsyncadd [#allocation5], 4294967168 }
 0x293   :  { %223 = vsyncpa [#allocation4], 1 }
 0x294   :  { %224 = vsyncpa [#allocation7], 1 }
 0x295   :  { %225 = vsyncpa [#allocation5], 1 }

</bundles_post_ra>
